<compile_context>
chip_gen: v6e
topology: v6e:2x2x1
jax: 0.10.0
libtpu: 0.0.40
codegen_flags: <defaults>
</compile_context>

<pallas_src>
import functools

import jax
import jax.numpy as jnp
from jax.experimental import pallas as pl
from jax.experimental.pallas import tpu as pltpu


def _round_up(x, m):
    return ((x + m - 1) // m) * m


def mlp_decoder_kernel(zsrc_ref, zdst_ref, g_ref,
                       w1s_ref, w1d_ref, w1g_ref, b1_ref,
                       w2_ref, b2_ref,
                       w3_ref, b3_ref,
                       w4_ref, b4_ref,
                       out_ref, *, apply_sigmoid):
    # Activations live as [features, TILE_E]; E is the lane axis.

    # Layer 1: Linear(2F+1 -> F) with the concat folded into split weights.
    h1 = jnp.dot(w1s_ref[...], zsrc_ref[...], preferred_element_type=jnp.float32)
    h1 = h1 + jnp.dot(w1d_ref[...], zdst_ref[...],
                      preferred_element_type=jnp.float32)
    h1 = h1 + w1g_ref[...] * g_ref[...]          # [F,1]*[1,TE] outer product (VPU)
    h1 = jnp.maximum(h1 + b1_ref[...], 0.0)

    # Layer 2: Linear(F -> M) + ReLU
    h2 = jnp.dot(w2_ref[...], h1.astype(jnp.bfloat16),
                 preferred_element_type=jnp.float32)
    h2 = jnp.maximum(h2 + b2_ref[...], 0.0)

    # Layer 3: Linear(M -> M) + ReLU
    h3 = jnp.dot(w3_ref[...], h2.astype(jnp.bfloat16),
                 preferred_element_type=jnp.float32)
    h3 = jnp.maximum(h3 + b3_ref[...], 0.0)

    # Layer 4: Linear(M -> 1) as multiply + sublane reduction (keeps lanes dense,
    # skips a 1-column MXU matmul).
    v = jnp.sum(h3 * w4_ref[...], axis=0, keepdims=True) + b4_ref[...]   # [1, TE]
    if apply_sigmoid:
        v = jax.nn.sigmoid(v)
    out_ref[...] = v


def linear_layer_decoder_forward(z, scene_attr, graph, edge_index, params,
                                 sigmoid=True, tile_e_max=512):
    """JAX/Pallas equivalent of LinearLayerDecoder.forward.

    z:          [N, F] float32
    scene_attr: unused (signature parity with the PyTorch module)
    graph:      [N, N] float32
    edge_index: [2, E] int32
    params:     dict from init_params (layer-1 weight pre-split, MXU weights bf16)
    """
    del scene_attr  # unused by the PyTorch forward as well

    src = edge_index[0]
    dst = edge_index[1]
    E = src.shape[0]
    F = z.shape[1]
    M = params["w2"].shape[0]

    # Gather glue stays in plain JAX; the concat itself is fused into the kernel.
    # TODO(synk): fully fuse the row gather into the kernel (scalar-prefetched
    # edge_index + in-kernel dynamic gather) if N/E grow beyond toy sizes.
    zsrcT = z[src].T.astype(jnp.bfloat16)                               # [F, E]
    zdstT = z[dst].T.astype(jnp.bfloat16)                               # [F, E]
    gT = jnp.squeeze(graph)[src, dst][None, :].astype(jnp.float32)      # [1, E]

    # Tile E along lanes; keep TILE_E modest (review: <= 4096 for v7x VMEM).
    tile_e = min(tile_e_max, _round_up(E, 128))
    e_pad = _round_up(E, tile_e)
    if e_pad != E:
        pad = e_pad - E
        zsrcT = jnp.pad(zsrcT, ((0, 0), (0, pad)))
        zdstT = jnp.pad(zdstT, ((0, 0), (0, pad)))
        gT = jnp.pad(gT, ((0, 0), (0, pad)))

    grid = (e_pad // tile_e,)

    def edge_spec(rows):
        return pl.BlockSpec((rows, tile_e), lambda i: (0, i))

    def const_spec(shape):
        return pl.BlockSpec(shape, lambda i: (0, 0))

    kernel = functools.partial(mlp_decoder_kernel, apply_sigmoid=bool(sigmoid))

    out = pl.pallas_call(
        kernel,
        out_shape=jax.ShapeDtypeStruct((1, e_pad), jnp.float32),
        grid_spec=pltpu.PrefetchScalarGridSpec(
            num_scalar_prefetch=0,
            grid=grid,
            in_specs=[
                edge_spec(F),            # z_src^T  [F, E_pad]
                edge_spec(F),            # z_dst^T  [F, E_pad]
                edge_spec(1),            # g^T      [1, E_pad]
                const_spec((F, F)),      # w1_src   (bf16)
                const_spec((F, F)),      # w1_dst   (bf16)
                const_spec((F, 1)),      # w1_g     (f32)
                const_spec((F, 1)),      # b1
                const_spec((M, F)),      # w2       (bf16)
                const_spec((M, 1)),      # b2
                const_spec((M, M)),      # w3       (bf16)
                const_spec((M, 1)),      # b3
                const_spec((M, 1)),      # w4       (f32, reduction weight)
                const_spec((1, 1)),      # b4
            ],
            out_specs=pl.BlockSpec((1, tile_e), lambda i: (0, i)),
        ),
        compiler_params=pltpu.CompilerParams(
            dimension_semantics=("parallel",)),
    )(zsrcT, zdstT, gT,
      params["w1_src"], params["w1_dst"], params["w1_g"], params["b1"],
      params["w2"], params["b2"],
      params["w3"], params["b3"],
      params["w4"], params["b4"])

    # [1, E_pad] lane-dense slab -> [E, 1] to match the PyTorch module.
    return out[0, :E][:, None]


def init_params(key, feat_dim, middle_dim):
    """Mirror nn.Linear default init (uniform +-1/sqrt(fan_in)).

    Weights stored PyTorch-style [out, in]; layer 1 pre-split into src/dst/g
    pieces; MXU weights cast to bf16, biases and VPU weights kept f32.
    """
    in_dim = 2 * feat_dim + 1

    def linear(k, fan_in, fan_out):
        kw, kb = jax.random.split(k)
        bound = 1.0 / jnp.sqrt(jnp.float32(fan_in))
        w = jax.random.uniform(kw, (fan_out, fan_in), jnp.float32, -bound, bound)
        b = jax.random.uniform(kb, (fan_out, 1), jnp.float32, -bound, bound)
        return w, b

    k1, k2, k3, k4 = jax.random.split(key, 4)
    params = {}

    w1, b1 = linear(k1, in_dim, feat_dim)                   # [F, 2F+1]
    params["w1_src"] = w1[:, :feat_dim].astype(jnp.bfloat16)
    params["w1_dst"] = w1[:, feat_dim:2 * feat_dim].astype(jnp.bfloat16)
    params["w1_g"] = w1[:, 2 * feat_dim:]                   # [F, 1] f32
    params["b1"] = b1

    w2, b2 = linear(k2, feat_dim, middle_dim)
    params["w2"] = w2.astype(jnp.bfloat16)
    params["b2"] = b2

    w3, b3 = linear(k3, middle_dim, middle_dim)
    params["w3"] = w3.astype(jnp.bfloat16)
    params["b3"] = b3

    w4, b4 = linear(k4, middle_dim, 1)                      # [1, M]
    params["w4"] = w4.T                                     # [M, 1] f32
    params["b4"] = b4                                       # [1, 1]
    return params


def reference_forward(z, graph, edge_index, params, sigmoid=True):
    """Pure-JAX reference mirroring the kernel's bf16-MXU / f32-elementwise math."""
    src, dst = edge_index[0], edge_index[1]
    g = jnp.squeeze(graph)[src, dst][:, None]                         # [E, 1]
    zs = z[src].astype(jnp.bfloat16)
    zd = z[dst].astype(jnp.bfloat16)
    h1 = (jnp.dot(zs, params["w1_src"].T, preferred_element_type=jnp.float32)
          + jnp.dot(zd, params["w1_dst"].T, preferred_element_type=jnp.float32)
          + g * params["w1_g"].T + params["b1"].T)
    h1 = jnp.maximum(h1, 0.0)
    h2 = jnp.maximum(
        jnp.dot(h1.astype(jnp.bfloat16), params["w2"].T,
                preferred_element_type=jnp.float32) + params["b2"].T, 0.0)
    h3 = jnp.maximum(
        jnp.dot(h2.astype(jnp.bfloat16), params["w3"].T,
                preferred_element_type=jnp.float32) + params["b3"].T, 0.0)
    v = h3 @ params["w4"] + params["b4"]                              # [E, 1]
    return jax.nn.sigmoid(v) if sigmoid else v


if __name__ == "__main__":
    key = jax.random.PRNGKey(0)

    # Small, module-consistent shapes.
    N = 8            # number of nodes
    feat_dim = 32    # F
    middle_dim = 32  # M
    E = 16           # number of edges

    k1, k2, k3, k4, kp = jax.random.split(key, 5)
    z = jax.random.normal(k1, (N, feat_dim), jnp.float32)
    scene_attr = jax.random.normal(k2, (N, 4), jnp.float32)   # unused by forward
    graph = jax.random.normal(k3, (N, N), jnp.float32)
    edge_index = jax.random.randint(k4, (2, E), 0, N, jnp.int32)

    params = init_params(kp, feat_dim, middle_dim)

    out = linear_layer_decoder_forward(z, scene_attr, graph, edge_index, params,
                                       sigmoid=True)
    out = jax.block_until_ready(out)
    assert out.shape == (E, 1)

    ref = reference_forward(z, graph, edge_index, params, sigmoid=True)
    assert jnp.allclose(out, ref, atol=1e-3, rtol=1e-3), (
        "sigmoid=True mismatch: max abs diff "
        f"{float(jnp.max(jnp.abs(out - ref))):.3e}")

    # Exercise the trace-time sigmoid=False path (raw logits, no inversion).
    out_raw = jax.block_until_ready(
        linear_layer_decoder_forward(z, scene_attr, graph, edge_index, params,
                                     sigmoid=False))
    ref_raw = reference_forward(z, graph, edge_index, params, sigmoid=False)
    assert jnp.allclose(out_raw, ref_raw, atol=1e-2, rtol=1e-2), (
        "sigmoid=False mismatch: max abs diff "
        f"{float(jnp.max(jnp.abs(out_raw - ref_raw))):.3e}")

    print("KERNEL_OK")
</pallas_src>

<mosaic_0001>
module attributes {stable_mosaic.version = 11 : i64} {
  func.func @mlp_decoder_kernel(%arg0: i32, %arg1: memref<32x128xbf16, #tpu.memory_space<vmem>>, %arg2: memref<32x128xbf16, #tpu.memory_space<vmem>>, %arg3: memref<1x128xf32, #tpu.memory_space<vmem>>, %arg4: memref<32x32xbf16, #tpu.memory_space<vmem>>, %arg5: memref<32x32xbf16, #tpu.memory_space<vmem>>, %arg6: memref<32x1xf32, #tpu.memory_space<vmem>>, %arg7: memref<32x1xf32, #tpu.memory_space<vmem>>, %arg8: memref<32x32xbf16, #tpu.memory_space<vmem>>, %arg9: memref<32x1xf32, #tpu.memory_space<vmem>>, %arg10: memref<32x32xbf16, #tpu.memory_space<vmem>>, %arg11: memref<32x1xf32, #tpu.memory_space<vmem>>, %arg12: memref<32x1xf32, #tpu.memory_space<vmem>>, %arg13: memref<1x1xf32, #tpu.memory_space<vmem>>, %arg14: memref<1x128xf32, #tpu.memory_space<vmem>>) attributes {dimension_semantics = [#tpu.dimension_semantics<parallel>], iteration_bounds = array<i64: 1>, scalar_prefetch = 0 : i64, scratch_operands = 0 : i64, tpu.core_type = #tpu.core_type<tc>, window_params = [{transform_indices = @transform_0, window_bounds = array<i64: 32, 128>}, {transform_indices = @transform_1, window_bounds = array<i64: 32, 128>}, {transform_indices = @transform_2, window_bounds = array<i64: 1, 128>}, {pipeline_mode = #tpu.pipeline_mode<synchronous>, transform_indices = @transform_3, window_bounds = array<i64: 32, 32>}, {pipeline_mode = #tpu.pipeline_mode<synchronous>, transform_indices = @transform_4, window_bounds = array<i64: 32, 32>}, {pipeline_mode = #tpu.pipeline_mode<synchronous>, transform_indices = @transform_5, window_bounds = array<i64: 32, 1>}, {pipeline_mode = #tpu.pipeline_mode<synchronous>, transform_indices = @transform_6, window_bounds = array<i64: 32, 1>}, {pipeline_mode = #tpu.pipeline_mode<synchronous>, transform_indices = @transform_7, window_bounds = array<i64: 32, 32>}, {pipeline_mode = #tpu.pipeline_mode<synchronous>, transform_indices = @transform_8, window_bounds = array<i64: 32, 1>}, {pipeline_mode = #tpu.pipeline_mode<synchronous>, transform_indices = @transform_9, window_bounds = array<i64: 32, 32>}, {pipeline_mode = #tpu.pipeline_mode<synchronous>, transform_indices = @transform_10, window_bounds = array<i64: 32, 1>}, {pipeline_mode = #tpu.pipeline_mode<synchronous>, transform_indices = @transform_11, window_bounds = array<i64: 32, 1>}, {pipeline_mode = #tpu.pipeline_mode<synchronous>, transform_indices = @transform_12, window_bounds = array<i64: 1, 1>}, {transform_indices = @transform_13, window_bounds = array<i64: 1, 128>}]} {
    %c0 = arith.constant 0 : index
    %c0_0 = arith.constant 0 : index
    %0 = vector.load %arg4[%c0, %c0_0] : memref<32x32xbf16, #tpu.memory_space<vmem>>, vector<32x32xbf16>
    %c0_1 = arith.constant 0 : index
    %c0_2 = arith.constant 0 : index
    %1 = vector.load %arg1[%c0_1, %c0_2] : memref<32x128xbf16, #tpu.memory_space<vmem>>, vector<32x128xbf16>
    %cst = arith.constant dense<0.000000e+00> : vector<32x128xf32>
    %2 = tpu.matmul %0, %1, %cst {dimension_numbers = #tpu.dot_dimension_numbers<[1], [0], [0], [1], [0, 0, 1, 1], [], []>} : vector<32x32xbf16>, vector<32x128xbf16>, vector<32x128xf32> -> vector<32x128xf32>
    %c0_3 = arith.constant 0 : index
    %c0_4 = arith.constant 0 : index
    %3 = vector.load %arg5[%c0_3, %c0_4] : memref<32x32xbf16, #tpu.memory_space<vmem>>, vector<32x32xbf16>
    %c0_5 = arith.constant 0 : index
    %c0_6 = arith.constant 0 : index
    %4 = vector.load %arg2[%c0_5, %c0_6] : memref<32x128xbf16, #tpu.memory_space<vmem>>, vector<32x128xbf16>
    %cst_7 = arith.constant dense<0.000000e+00> : vector<32x128xf32>
    %5 = tpu.matmul %3, %4, %cst_7 {dimension_numbers = #tpu.dot_dimension_numbers<[1], [0], [0], [1], [0, 0, 1, 1], [], []>} : vector<32x32xbf16>, vector<32x128xbf16>, vector<32x128xf32> -> vector<32x128xf32>
    %6 = arith.addf %2, %5 : vector<32x128xf32>
    %c0_8 = arith.constant 0 : index
    %c0_9 = arith.constant 0 : index
    %7 = vector.load %arg6[%c0_8, %c0_9] : memref<32x1xf32, #tpu.memory_space<vmem>>, vector<32x1xf32>
    %c0_10 = arith.constant 0 : index
    %c0_11 = arith.constant 0 : index
    %8 = vector.load %arg3[%c0_10, %c0_11] : memref<1x128xf32, #tpu.memory_space<vmem>>, vector<1x128xf32>
    %9 = vector.broadcast %7 : vector<32x1xf32> to vector<32x128xf32>
    %10 = vector.broadcast %8 : vector<1x128xf32> to vector<32x128xf32>
    %11 = arith.mulf %9, %10 : vector<32x128xf32>
    %12 = arith.addf %6, %11 : vector<32x128xf32>
    %c0_12 = arith.constant 0 : index
    %c0_13 = arith.constant 0 : index
    %13 = vector.load %arg7[%c0_12, %c0_13] : memref<32x1xf32, #tpu.memory_space<vmem>>, vector<32x1xf32>
    %14 = vector.broadcast %13 : vector<32x1xf32> to vector<32x128xf32>
    %15 = arith.addf %12, %14 : vector<32x128xf32>
    %cst_14 = arith.constant 0.000000e+00 : f32
    %16 = vector.broadcast %cst_14 : f32 to vector<32x128xf32>
    %17 = arith.maximumf %15, %16 : vector<32x128xf32>
    %c0_15 = arith.constant 0 : index
    %c0_16 = arith.constant 0 : index
    %18 = vector.load %arg8[%c0_15, %c0_16] : memref<32x32xbf16, #tpu.memory_space<vmem>>, vector<32x32xbf16>
    %19 = arith.truncf %17 : vector<32x128xf32> to vector<32x128xbf16>
    %cst_17 = arith.constant dense<0.000000e+00> : vector<32x128xf32>
    %20 = tpu.matmul %18, %19, %cst_17 {dimension_numbers = #tpu.dot_dimension_numbers<[1], [0], [0], [1], [0, 0, 1, 1], [], []>} : vector<32x32xbf16>, vector<32x128xbf16>, vector<32x128xf32> -> vector<32x128xf32>
    %c0_18 = arith.constant 0 : index
    %c0_19 = arith.constant 0 : index
    %21 = vector.load %arg9[%c0_18, %c0_19] : memref<32x1xf32, #tpu.memory_space<vmem>>, vector<32x1xf32>
    %22 = vector.broadcast %21 : vector<32x1xf32> to vector<32x128xf32>
    %23 = arith.addf %20, %22 : vector<32x128xf32>
    %cst_20 = arith.constant 0.000000e+00 : f32
    %24 = vector.broadcast %cst_20 : f32 to vector<32x128xf32>
    %25 = arith.maximumf %23, %24 : vector<32x128xf32>
    %c0_21 = arith.constant 0 : index
    %c0_22 = arith.constant 0 : index
    %26 = vector.load %arg10[%c0_21, %c0_22] : memref<32x32xbf16, #tpu.memory_space<vmem>>, vector<32x32xbf16>
    %27 = arith.truncf %25 : vector<32x128xf32> to vector<32x128xbf16>
    %cst_23 = arith.constant dense<0.000000e+00> : vector<32x128xf32>
    %28 = tpu.matmul %26, %27, %cst_23 {dimension_numbers = #tpu.dot_dimension_numbers<[1], [0], [0], [1], [0, 0, 1, 1], [], []>} : vector<32x32xbf16>, vector<32x128xbf16>, vector<32x128xf32> -> vector<32x128xf32>
    %c0_24 = arith.constant 0 : index
    %c0_25 = arith.constant 0 : index
    %29 = vector.load %arg11[%c0_24, %c0_25] : memref<32x1xf32, #tpu.memory_space<vmem>>, vector<32x1xf32>
    %30 = vector.broadcast %29 : vector<32x1xf32> to vector<32x128xf32>
    %31 = arith.addf %28, %30 : vector<32x128xf32>
    %cst_26 = arith.constant 0.000000e+00 : f32
    %32 = vector.broadcast %cst_26 : f32 to vector<32x128xf32>
    %33 = arith.maximumf %31, %32 : vector<32x128xf32>
    %c0_27 = arith.constant 0 : index
    %c0_28 = arith.constant 0 : index
    %34 = vector.load %arg12[%c0_27, %c0_28] : memref<32x1xf32, #tpu.memory_space<vmem>>, vector<32x1xf32>
    %35 = vector.broadcast %34 : vector<32x1xf32> to vector<32x128xf32>
    %36 = arith.mulf %33, %35 : vector<32x128xf32>
    %cst_29 = arith.constant dense<0.000000e+00> : vector<128xf32>
    %37 = vector.multi_reduction <add>, %36, %cst_29 [0] : vector<32x128xf32> to vector<128xf32>
    %38 = vector.shape_cast %37 : vector<128xf32> to vector<1x128xf32>
    %c0_30 = arith.constant 0 : index
    %c0_31 = arith.constant 0 : index
    %39 = vector.load %arg13[%c0_30, %c0_31] : memref<1x1xf32, #tpu.memory_space<vmem>>, vector<1x1xf32>
    %40 = vector.broadcast %39 : vector<1x1xf32> to vector<1x128xf32>
    %41 = arith.addf %38, %40 : vector<1x128xf32>
    %42 = arith.negf %41 : vector<1x128xf32>
    %43 = math.exp %42 : vector<1x128xf32>
    %cst_32 = arith.constant 1.000000e+00 : f32
    %44 = vector.broadcast %cst_32 : f32 to vector<1x128xf32>
    %45 = arith.addf %44, %43 : vector<1x128xf32>
    %46 = arith.divf %44, %45 : vector<1x128xf32>
    %c0_33 = arith.constant 0 : index
    %c0_34 = arith.constant 0 : index
    %47 = vector.load %arg14[%c0_33, %c0_34] : memref<1x128xf32, #tpu.memory_space<vmem>>, vector<1x128xf32>
    tpu.vector_store %arg14[%c0_33, %c0_34], %46 {strides = array<i32>} : memref<1x128xf32, #tpu.memory_space<vmem>>, vector<1x128xf32>,
    return
  }
  func.func @transform_0(%arg0: i32) -> (i32, i32) {
    %c0_i32 = arith.constant 0 : i32
    %c0_i32_0 = arith.constant 0 : i32
    return %c0_i32, %arg0 : i32, i32
  }
  func.func @transform_1(%arg0: i32) -> (i32, i32) {
    %c0_i32 = arith.constant 0 : i32
    %c0_i32_0 = arith.constant 0 : i32
    return %c0_i32, %arg0 : i32, i32
  }
  func.func @transform_2(%arg0: i32) -> (i32, i32) {
    %c0_i32 = arith.constant 0 : i32
    %c0_i32_0 = arith.constant 0 : i32
    return %c0_i32, %arg0 : i32, i32
  }
  func.func @transform_3(%arg0: i32) -> (i32, i32) {
    %c0_i32 = arith.constant 0 : i32
    %c0_i32_0 = arith.constant 0 : i32
    %c0_i32_1 = arith.constant 0 : i32
    return %c0_i32, %c0_i32_0 : i32, i32
  }
  func.func @transform_4(%arg0: i32) -> (i32, i32) {
    %c0_i32 = arith.constant 0 : i32
    %c0_i32_0 = arith.constant 0 : i32
    %c0_i32_1 = arith.constant 0 : i32
    return %c0_i32, %c0_i32_0 : i32, i32
  }
  func.func @transform_5(%arg0: i32) -> (i32, i32) {
    %c0_i32 = arith.constant 0 : i32
    %c0_i32_0 = arith.constant 0 : i32
    %c0_i32_1 = arith.constant 0 : i32
    return %c0_i32, %c0_i32_0 : i32, i32
  }
  func.func @transform_6(%arg0: i32) -> (i32, i32) {
    %c0_i32 = arith.constant 0 : i32
    %c0_i32_0 = arith.constant 0 : i32
    %c0_i32_1 = arith.constant 0 : i32
    return %c0_i32, %c0_i32_0 : i32, i32
  }
  func.func @transform_7(%arg0: i32) -> (i32, i32) {
    %c0_i32 = arith.constant 0 : i32
    %c0_i32_0 = arith.constant 0 : i32
    %c0_i32_1 = arith.constant 0 : i32
    return %c0_i32, %c0_i32_0 : i32, i32
  }
  func.func @transform_8(%arg0: i32) -> (i32, i32) {
    %c0_i32 = arith.constant 0 : i32
    %c0_i32_0 = arith.constant 0 : i32
    %c0_i32_1 = arith.constant 0 : i32
    return %c0_i32, %c0_i32_0 : i32, i32
  }
  func.func @transform_9(%arg0: i32) -> (i32, i32) {
    %c0_i32 = arith.constant 0 : i32
    %c0_i32_0 = arith.constant 0 : i32
    %c0_i32_1 = arith.constant 0 : i32
    return %c0_i32, %c0_i32_0 : i32, i32
  }
  func.func @transform_10(%arg0: i32) -> (i32, i32) {
    %c0_i32 = arith.constant 0 : i32
    %c0_i32_0 = arith.constant 0 : i32
    %c0_i32_1 = arith.constant 0 : i32
    return %c0_i32, %c0_i32_0 : i32, i32
  }
  func.func @transform_11(%arg0: i32) -> (i32, i32) {
    %c0_i32 = arith.constant 0 : i32
    %c0_i32_0 = arith.constant 0 : i32
    %c0_i32_1 = arith.constant 0 : i32
    return %c0_i32, %c0_i32_0 : i32, i32
  }
  func.func @transform_12(%arg0: i32) -> (i32, i32) {
    %c0_i32 = arith.constant 0 : i32
    %c0_i32_0 = arith.constant 0 : i32
    %c0_i32_1 = arith.constant 0 : i32
    return %c0_i32, %c0_i32_0 : i32, i32
  }
  func.func @transform_13(%arg0: i32) -> (i32, i32) {
    %c0_i32 = arith.constant 0 : i32
    %c0_i32_0 = arith.constant 0 : i32
    return %c0_i32, %arg0 : i32, i32
  }
}

</mosaic_0001>

<bundles_post_ra>
// kernel: tpu_custom_call.1
= control target key start
LH: loop header
LB: loop body
LE: loop exit
PB: predicated region body
PF: predicated region fallthrough
CT: control target
= control target key end

     0   :  { %s854_s0 = inlined_call_operand.vmem [shape: bf16[32,128], index: 0, kind: input, shape index: {}]   ;;  %s855_s1 = inlined_call_operand.vmem [shape: bf16[32,128], index: 1, kind: input, shape index: {}]   ;;  %s856_s2 = inlined_call_operand.vmem [shape: f32[1,128], index: 2, kind: input, shape index: {}]   ;;  %s857_s3 = inlined_call_operand.vmem [shape: bf16[32,32], index: 3, kind: input, shape index: {}]   ;;  %s858_s4 = inlined_call_operand.vmem [shape: bf16[32,32], index: 4, kind: input, shape index: {}]   ;;  %s859_s5 = inlined_call_operand.vmem [shape: f32[32,1], index: 5, kind: input, shape index: {}]   ;;  %s860_s6 = inlined_call_operand.vmem [shape: f32[32,1], index: 6, kind: input, shape index: {}]   ;;  %s861_s7 = inlined_call_operand.vmem [shape: bf16[32,32], index: 7, kind: input, shape index: {}]   ;;  %s862_s8 = inlined_call_operand.vmem [shape: f32[32,1], index: 8, kind: input, shape index: {}]   ;;  %s863_s9 = inlined_call_operand.vmem [shape: bf16[32,32], index: 9, kind: input, shape index: {}]   ;;  %s864_s10 = inlined_call_operand.vmem [shape: f32[32,1], index: 10, kind: input, shape index: {}]   ;;  %s865_s11 = inlined_call_operand.vmem [shape: f32[32,1], index: 11, kind: input, shape index: {}]   ;;  %s866_s12 = inlined_call_operand.<no memory space> [shape: f32[1,1], index: 12, kind: input, shape index: {}]   ;;  %s867_s13 = inlined_call_operand.hbm [shape: f32[1,128], index: 13, kind: output, shape index: {}]  }
   0x1   :  { %v18_v0 = vstv %s866_s12 }
   0x2   :  { %19 = vst [vmem:[#allocation2] sm:$0x1] %v18_v0 }
   0x3   :  { %v631_v1 = vld [vmem:[%s855_s1 + $0x8] sm:$0xff]   ;;  %v633_v3 = vld [vmem:[%s855_s1] sm:$0xff]   ;;  %v669_v4 = vmov 0   ;;  %vm86_vm0 = vcmask 261120   ;;  %v221_v10 = vld [vmem:[%s859_s5 + $0x10] sm:$0xff] }
   0x4   :  { %v632_v2 = vld [vmem:[%s854_s0 + $0x8] sm:$0xff]   ;;  %595 = vmatprep.subr.bf16.mxu0 %v631_v1  ;;  %629 = vset.pattern.permute.xlu0 %v669_v4  ;;  %v634_v5 = vld [vmem:[%s854_s0] sm:$0xff]   ;;  %v222_v12 = vld [vmem:[%s859_s5 + $0x18] sm:$0xff] }
   0x5   :  { %603 = vmatprep.subr.bf16.mxu1 %v632_v2  ;;  %596 = vmatpush3.bf16.msra.mxu0 %v631_v1  ;;  %v635_v6 = vld [vmem:[%s858_s4] sm:$0xff]   ;;  %v637_v8 = vld [vmem:[%s858_s4 + $0x8] sm:$0xff]   ;;  %v260_v14 = vld [vmem:[%s860_s6 + $0x10] sm:$0xff] }
   0x6   :  { %604 = vmatpush3.bf16.msra.mxu1 %v632_v2  ;;  %597 = vmatprep.subr.bf16.mxu0 %v633_v3  ;;  %v636_v7 = vld [vmem:[%s857_s3] sm:$0xff]   ;;  %v638_v9 = vld [vmem:[%s857_s3 + $0x8] sm:$0xff]   ;;  %v261_v15 = vld [vmem:[%s860_s6 + $0x18] sm:$0xff] }
   0x7   :  { %605 = vmatprep.subr.bf16.mxu1 %v634_v5  ;;  %630 = vset.pattern.permute.xlu1 %v669_v4  ;;  %v219_v11 = vld [vmem:[%s859_s5] sm:$0xff]  ;;  %v220_v13 = vld [vmem:[%s859_s5 + $0x8] sm:$0xff] }
   0x8   :  { %599 = vmatprep.mubr.msk.bf16.mxu0 %vm86_vm0, %v635_v6  ;;  %607 = vmatprep.mubr.msk.bf16.mxu1 %vm86_vm0, %v636_v7  ;;  %v258_v16 = vld [vmem:[%s860_s6] sm:$0xff]  ;;  %v259_v17 = vld [vmem:[%s860_s6 + $0x8] sm:$0xff] }
   0x9   :  { %598 = vmatpush3.bf16.msra.mxu0 %v633_v3  ;;  %236 = vperm.xlu0 %629, %v221_v10  }
   0xa   :  { %606 = vmatpush3.bf16.msra.mxu1 %v634_v5  ;;  %226 = vperm.xlu1 %630, %v219_v11  }
   0xc   :  { %600 = vmatmul.mubr.msk.bf16.vlgmr.msra.gmra.mxu0 %vm86_vm0, %v637_v8 }
   0xd   :  { %608 = vmatmul.mubr.msk.bf16.vlgmr.msra.gmra.mxu1 %vm86_vm0, %v638_v9  ;;  %241 = vperm.xlu0 %629, %v222_v12  }
   0xe   :  { %231 = vperm.xlu1 %630, %v220_v13  }
  0x11   :  { %274 = vperm.xlu0 %629, %v260_v14  }
  0x12   :  { %279 = vperm.xlu1 %630, %v261_v15  }
  0x13   :  { %20 = vsyncpa [#allocation4], 0  ;;  %v298_v18 = vld [vmem:[%s862_s8 + $0x10] sm:$0xff]  ;;  %v299_v19 = vld [vmem:[%s862_s8 + $0x18] sm:$0xff] }
  0x14   :  { %v296_v20 = vld [vmem:[%s862_s8] sm:$0xff]  ;;  %v297_v21 = vld [vmem:[%s862_s8 + $0x8] sm:$0xff]  ;;  %v397_v24 = vld [vmem:[%s864_s10 + $0x10] sm:$0xff] }
  0x15   :  { %264 = vperm.xlu0 %629, %v258_v16   ;;  %v395_v22 = vld [vmem:[%s864_s10] sm:$0xff]  ;;  %v396_v23 = vld [vmem:[%s864_s10 + $0x8] sm:$0xff]  ;;  %v398_v25 = vld [vmem:[%s864_s10 + $0x18] sm:$0xff] }
  0x16   :  { %269 = vperm.xlu1 %630, %v259_v17   ;;  %v488_v26 = vld [vmem:[%s865_s11] sm:$0xff]  ;;  %v489_v27 = vld [vmem:[%s865_s11 + $0x8] sm:$0xff]  ;;  %v490_v28 = vld [vmem:[%s865_s11 + $0x10] sm:$0xff] }
  0x17   :  { %v491_v29 = vld [vmem:[%s865_s11 + $0x18] sm:$0xff]  ;;  %v525_v30 = vld [vmem:[#allocation2] sm:$0x1]  ;;  %v640_v7 = vld [vmem:[%s861_s7 + $0x8] sm:$0xff]  }
  0x18   :  { %v639_v31 = vld [vmem:[%s861_s7] sm:$0xff]  }
  0x19   :  { %312 = vperm.xlu0 %629, %v298_v18   ;;  %615 = vmatprep.mubr.msk.bf16.mxu0 %vm86_vm0, %v639_v31  ;;  %v569_v34 = vld [vmem:[%s856_s2] ss:$0 sm:$0xff] }
  0x1a   :  { %317 = vperm.xlu1 %630, %v299_v19   ;;  %v641_v8 = vld [vmem:[%s863_s9] sm:$0xff]  }
  0x1b   :  { %623 = vmatprep.mubr.msk.bf16.mxu1 %vm86_vm0, %v641_v8 }
  0x1d   :  { %302 = vperm.xlu0 %629, %v296_v20  }
  0x1e   :  { %307 = vperm.xlu1 %630, %v297_v21  }
  0x21   :  { %401 = vperm.xlu0 %629, %v395_v22  }
  0x22   :  { %406 = vperm.xlu1 %630, %v396_v23  }
  0x25   :  { %411 = vperm.xlu0 %629, %v397_v24  }
  0x26   :  { %416 = vperm.xlu1 %630, %v398_v25  }
  0x29   :  { %494 = vperm.xlu0 %629, %v488_v26  }
  0x2a   :  { %499 = vperm.xlu1 %630, %v489_v27   ;;  %v642_v27 = vld [vmem:[%s863_s9 + $0x8] sm:$0xff]   ;;  %s670_s9 = smov [#allocation3]  }
  0x2b   :  { %s549_s0 = sshll.u32 %s670_s9, 4  ;;  %s550_s0 = int_to_ptr.vmem [resolvable:$true] %s549_s0 }
  0x2c   :  { %s647_s22 = scalar_lea.vmem %s550_s0, 16  ;;  %s651_s23 = scalar_lea.vmem %s550_s0, 32 }
  0x2d   :  { %504 = vperm.xlu0 %629, %v490_v28   ;;  %p648_p0 = scmp.ne.s32.totalorder %s550_s0, %s647_s22  ;;  %p652_p1 = scmp.lt.s32.totalorder %s550_s0, %s550_s0 }
  0x2e   :  { %509 = vperm.xlu1 %630, %v491_v29   ;;  %p653_p2 = scmp.lt.s32.totalorder %s651_s23, %s647_s22 }
  0x30   :  { %p654_p3 = por %p653_p2, %p652_p1 }
  0x31   :  { %528 = vperm.xlu0 %629, %v525_v30  }
  0x32   :  { %p655_p4 = pnand %p654_p3, %p648_p0 }
  0x84   :  { %v237_v32 = vpop.permute.xlu0 %236 }
  0x85   :  { %v227_v33 = vpop.permute.xlu1 %226  ;;  %v252_v37 = vmul.f32 %v569_v34, %v237_v32 }
  0x86   :  { %v250_v44 = vmul.f32 %v569_v34, %v227_v33 }
  0x88   :  { %v242_v35 = vpop.permute.xlu0 %241 }
  0x89   :  { %v232_v36 = vpop.permute.xlu1 %231  ;;  %v253_v50 = vmul.f32 %v569_v34, %v242_v35 }
  0x8a   :  { %v251_v55 = vmul.f32 %v569_v34, %v232_v36 }
  0x8c   :  { %v275_v42 = vpop.permute.xlu0 %274 }
  0x8d   :  { %v280_v48 = vpop.permute.xlu1 %279 }
  0x90   :  { %v265_v59 = vpop.permute.xlu0 %264 }
  0x91   :  { %v270_v63 = vpop.permute.xlu1 %269 }
  0x94   :  { %v313_v9 = vpop.permute.xlu0 %312 }
  0x95   :  { %v318_v10 = vpop.permute.xlu1 %317 }
  0x98   :  { %v303_v14 = vpop.permute.xlu0 %302 }
  0x99   :  { %v308_v18 = vpop.permute.xlu1 %307 }
  0x9c   :  { %v402_v28 = vpop.permute.xlu0 %401 }
  0x9d   :  { %v407_v29 = vpop.permute.xlu1 %406 }
  0xa0   :  { %v412_v30 = vpop.permute.xlu0 %411 }
  0xa1   :  { %v417_v32 = vpop.permute.xlu1 %416 }
  0xcc   :  { %v601_v38 = vpop.f32.mrf.mxu0 }
  0xcd   :  { %v609_v39 = vpop.f32.mrf.mxu1 }
  0xce   :  { %v213_v40 = vadd.f32 %v609_v39, %v601_v38  ;;  %v127_v41 = vpop.f32.mrf.mxu0 }
  0xcf   :  { %v204_v43 = vpop.f32.mrf.mxu1 }
  0xd0   :  { %v256_v45 = vadd.f32 %v252_v37, %v213_v40  ;;  %v205_v46 = vadd.f32 %v204_v43, %v127_v41  ;;  %v602_v47 = vpop.f32.mrf.mxu0  ;;  %v495_v37 = vpop.permute.xlu0 %494 }
  0xd1   :  { %v610_v49 = vpop.f32.mrf.mxu1 }
  0xd2   :  { %v254_v51 = vadd.f32 %v250_v44, %v205_v46  ;;  %v216_v52 = vadd.f32 %v610_v49, %v602_v47  ;;  %v130_v53 = vpop.f32.mrf.mxu0  ;;  %v284_v56 = vadd.f32 %v275_v42, %v256_v45  ;;  %v500_v42 = vpop.permute.xlu1 %499 }
  0xd3   :  { %v207_v54 = vpop.f32.mrf.mxu1 }
  0xd4   :  { %v257_v57 = vadd.f32 %v253_v50, %v216_v52  ;;  %v208_v58 = vadd.f32 %v207_v54, %v130_v53  ;;  %v282_v60 = vadd.f32 %v265_v59, %v254_v51  ;;  %v288_v0 = vmax.f32 %v284_v56, 0.0 }
  0xd5   :  { %v531_v54 = vlaneseq }
  0xd6   :  { %v285_v61 = vadd.f32 %v280_v48, %v257_v57  ;;  %v255_v62 = vadd.f32 %v251_v55, %v208_v58  ;;  %v286_v3 = vmax.f32 %v282_v60, 0.0  ;;  %v505_v48 = vpop.permute.xlu0 %504  ;;  %v510_v51 = vpop.permute.xlu1 %509 }
  0xd7   :  { %v532_v57 = vshrl.u32 %v531_v54, 7 }
  0xd8   :  { %v289_v1 = vmax.f32 %v285_v61, 0.0  ;;  %v283_v2 = vadd.f32 %v270_v63, %v255_v62 }
  0xd9   :  { %v533_v60 = vsub.s32 0, %v532_v57 }
  0xda   :  { %v287_v4 = vmax.f32 %v283_v2, 0.0  ;;  %v295_v5 = vpack.c.bf16 %v289_v1, %v288_v0  ;;  %v529_v62 = vpop.permute.xlu0 %528 }
  0xdb   :  { %v534_v0 = vrot.slane %v529_v62, %v533_v60 }
  0xdc   :  { %611 = vmatprep.subr.bf16.mxu0 %v295_v5  ;;  %v294_v6 = vpack.c.bf16 %v287_v4, %v286_v3 }
  0xdd   :  { %612 = vmatpush3.bf16.msra.mxu0 %v295_v5 }
  0xde   :  { %613 = vmatprep.subr.bf16.mxu0 %v294_v6 }
  0xe1   :  { %614 = vmatpush3.bf16.msra.mxu0 %v294_v6 }
  0xe4   :  { %616 = vmatmul.mubr.msk.bf16.vlgmr.msra.gmra.mxu0 %vm86_vm0, %v640_v7 }
 0x1a4   :  { %v617_v11 = vpop.f32.mrf.mxu0 }
 0x1a5   :  { %v379_v13 = vadd.f32 %v617_v11, %v313_v9 }
 0x1a6   :  { %v370_v12 = vpop.f32.mrf.mxu0 }
 0x1a7   :  { %v371_v16 = vadd.f32 %v370_v12, %v303_v14  ;;  %v387_v20 = vmax.f32 %v379_v13, 0.0 }
 0x1a8   :  { %v618_v15 = vpop.f32.mrf.mxu0 }
 0x1a9   :  { %v382_v17 = vadd.f32 %v618_v15, %v318_v10  ;;  %v385_v23 = vmax.f32 %v371_v16, 0.0 }
 0x1aa   :  { %v373_v19 = vpop.f32.mrf.mxu0 }
 0x1ab   :  { %v388_v21 = vmax.f32 %v382_v17, 0.0  ;;  %v374_v22 = vadd.f32 %v373_v19, %v308_v18 }
 0x1ad   :  { %v394_v24 = vpack.c.bf16 %v388_v21, %v387_v20  ;;  %v386_v25 = vmax.f32 %v374_v22, 0.0 }
 0x1af   :  { %v393_v26 = vpack.c.bf16 %v386_v25, %v385_v23  ;;  %619 = vmatprep.subr.bf16.mxu1 %v394_v24 }
 0x1b0   :  { %620 = vmatpush3.bf16.msra.mxu1 %v394_v24 }
 0x1b1   :  { %621 = vmatprep.subr.bf16.mxu1 %v393_v26 }
 0x1b4   :  { %622 = vmatpush3.bf16.msra.mxu1 %v393_v26 }
 0x1b7   :  { %624 = vmatmul.mubr.msk.bf16.vlgmr.msra.gmra.mxu1 %vm86_vm0, %v642_v27 }
 0x277   :  { %v625_v31 = vpop.f32.mrf.mxu1 }
 0x278   :  { %v478_v36 = vadd.f32 %v625_v31, %v412_v30 }
 0x279   :  { %v469_v33 = vpop.f32.mrf.mxu1 }
 0x27a   :  { %v470_v34 = vadd.f32 %v469_v33, %v402_v28  ;;  %v486_v43 = vmax.f32 %v478_v36, 0.0 }
 0x27b   :  { %v626_v35 = vpop.f32.mrf.mxu1 }
 0x27c   :  { %v484_v39 = vmax.f32 %v470_v34, 0.0  ;;  %v481_v40 = vadd.f32 %v626_v35, %v417_v32  ;;  %v514_v49 = vmul.f32 %v505_v48, %v486_v43 }
 0x27d   :  { %v472_v38 = vpop.f32.mrf.mxu1 }
 0x27e   :  { %v473_v41 = vadd.f32 %v472_v38, %v407_v29  ;;  %v512_v45 = vmul.f32 %v495_v37, %v484_v39  ;;  %v487_v46 = vmax.f32 %v481_v40, 0.0 }
 0x280   :  { %v485_v44 = vmax.f32 %v473_v41, 0.0  ;;  %v515_v52 = vmul.f32 %v510_v51, %v487_v46 }
 0x282   :  { %v513_v47 = vmul.f32 %v500_v42, %v485_v44 }
 0x284   :  { %v516_v50 = vadd.f32 %v513_v47, %v512_v45 }
 0x286   :  { %v517_v53 = vadd.f32 %v516_v50, %v514_v49 }
 0x288   :  { %v518_v55 = vadd.f32 %v517_v53, %v515_v52 }
 0x28a   :  { %v519_v56 = vrot.slane %v518_v55, 4 }
 0x28c   :  { %v520_v58 = vadd.f32 %v519_v56, %v518_v55 }
 0x28e   :  { %v521_v59 = vrot.slane %v520_v58, 2 }
 0x290   :  { %v522_v61 = vadd.f32 %v521_v59, %v520_v58 }
 0x292   :  { %v523_v63 = vrot.slane %v522_v61, 1 }
 0x294   :  { %v524_v1 = vadd.f32 %v523_v63, %v522_v61 }
 0x296   :  { %v535_v2 = vadd.f32 %v534_v0, %v524_v1 }
 0x298   :  { %v578_v3 = vmul.f32 -1.442695, %v535_v2 }
 0x29a   :  { %643 = vpow2.f32 %v578_v3 }
 0x2a7   :  { %v644_v4 = vpop.eup %643 }
 0x2a8   :  { %v539_v5 = vadd.f32 1.0, %v644_v4 }
 0x2aa   :  { %645 = vrcp.f32 %v539_v5 }
 0x2b7   :  { %v646_v6 = vpop.eup %645 }
 0x2b8   :  { %542 = vst [vmem:[#allocation3] sm:$0x1] %v646_v6 }
 0x2b9   :  { %658 = shalt.err (!%p655_p4)
}
 0x2ba   :  { %552 = dma.vmem_to_hbm [thread:$0]  %s550_s0, 16, %s867_s13, [#allocation4]  }
 0x2bb   :  { %667 = dma.done.wait [#allocation4], 16  }
 0x2bc   :  { %668 = vsyncadd [#allocation4], 4294967280 }
 0x2bd   :  { %556 = vsyncpa [#allocation4], 1 }

</bundles_post_ra>
